<compile_context>
chip_gen: v7x
topology: tpu7x:2x2x1
jax: 0.10.0
libtpu: 0.0.40
codegen_flags: <defaults>
</compile_context>

<pallas_src>
import jax
import jax.numpy as jnp
from jax.experimental import pallas as pl
from jax.experimental.pallas import tpu as pltpu

D_IN = 310
D_H1 = 256
D_LAT = 512
D_H2 = 256
D_OUT = 310


def _round_up(n, m):
    return ((n + m - 1) // m) * m


def _autoencoder_kernel(x_ref,
                        w1_ref, b1_ref,
                        w23_ref, b23_ref,
                        w4_ref, b4_ref,
                        o_ref):
    bf16 = jnp.bfloat16

    # Encoder first layer: Linear(310->256) + ReLU (x already bf16; f32 accumulate / bias / ReLU).
    h = jnp.dot(x_ref[...], w1_ref[...], preferred_element_type=jnp.float32) + b1_ref[...]
    h = jnp.maximum(h, 0.0)

    # Fused Linear(256->512) @ Linear(512->256) (no nonlinearity between them) + ReLU.
    h2 = jnp.dot(h.astype(bf16), w23_ref[...], preferred_element_type=jnp.float32) + b23_ref[...]
    h2 = jnp.maximum(h2, 0.0)

    # Decoder last layer: Linear(256->310).
    o_ref[...] = (jnp.dot(h2.astype(bf16), w4_ref[...], preferred_element_type=jnp.float32)
                  + b4_ref[...]).astype(o_ref.dtype)


def _prepare_params(params):
    """Kernel-ready params: bf16 weights, f32 biases; middle two linears fused (exact algebra)."""
    w1, b1, w2, b2, w3, b3, w4, b4 = params
    bf16 = jnp.bfloat16
    w23 = jnp.dot(w2, w3, preferred_element_type=jnp.float32)        # (256, 256)
    b23 = jnp.dot(b2, w3, preferred_element_type=jnp.float32) + b3   # (1, 256)
    return (w1.astype(bf16), b1.astype(jnp.float32),
            w23.astype(bf16), b23.astype(jnp.float32),
            w4.astype(bf16), b4.astype(jnp.float32))


def _choose_tile(batch, tile_b):
    # bf16 activations -> keep batch tiles a multiple of 16 sublanes; cap at tile_b and at the batch.
    tb = min(tile_b, _round_up(batch, 16))
    # v7x megacore: keep >= 2 grid steps (both TensorCores fed) whenever the batch allows it.
    if batch > 16 and pl.cdiv(batch, tb) < 2:
        tb = _round_up(pl.cdiv(batch, 2), 16)
    return tb


def autoencoder_forward(x, params, tile_b=512):
    """x: (B, 310) -> (B, 310) float32.

    Batch is tiled into tb-row blocks over a cdiv grid (ragged last block: OOB rows are masked on
    store and never affect valid rows). Weights/biases use constant index maps so they stay
    VMEM-resident; x is handed to the kernel in bf16 (kernel is bf16-MXU / f32-accumulate).
    """
    B = x.shape[0]
    w1b, b1f, w23b, b23f, w4b, b4f = _prepare_params(params)

    tb = _choose_tile(B, tile_b)
    grid = (pl.cdiv(B, tb),)

    x_b = x.astype(jnp.bfloat16)  # bit-identical to the in-kernel cast; halves x HBM bytes

    def const_spec(shape):
        return pl.BlockSpec(shape, lambda i: (0,) * len(shape))

    out = pl.pallas_call(
        _autoencoder_kernel,
        out_shape=jax.ShapeDtypeStruct((B, D_OUT), jnp.float32),
        grid=grid,
        in_specs=[
            pl.BlockSpec((tb, D_IN), lambda i: (i, 0)),     # x: tiled over batch (ragged last block)
            const_spec(w1b.shape), const_spec(b1f.shape),   # weights/biases: VMEM-resident
            const_spec(w23b.shape), const_spec(b23f.shape),
            const_spec(w4b.shape), const_spec(b4f.shape),
        ],
        out_specs=pl.BlockSpec((tb, D_OUT), lambda i: (i, 0)),
        compiler_params=pltpu.CompilerParams(
            dimension_semantics=("parallel",),
            vmem_limit_bytes=32 << 20,
        ),
    )(x_b, w1b, b1f, w23b, b23f, w4b, b4f)

    return out


def init_params(key):
    """Deterministic init matching the nn.Linear shapes (weights stored transposed: (in, out))."""
    ks = jax.random.split(key, 8)

    def linear(kw, kb, d_in, d_out):
        bound = 1.0 / jnp.sqrt(d_in)
        w = jax.random.uniform(kw, (d_in, d_out), jnp.float32, -bound, bound)
        b = jax.random.uniform(kb, (1, d_out), jnp.float32, -bound, bound)
        return w, b

    w1, b1 = linear(ks[0], ks[1], D_IN, D_H1)
    w2, b2 = linear(ks[2], ks[3], D_H1, D_LAT)
    w3, b3 = linear(ks[4], ks[5], D_LAT, D_H2)
    w4, b4 = linear(ks[6], ks[7], D_H2, D_OUT)
    return (w1, b1, w2, b2, w3, b3, w4, b4)


def _reference_f32(x, params):
    """Pure-f32 PyTorch-equivalent forward (unfused)."""
    w1, b1, w2, b2, w3, b3, w4, b4 = params
    h = jnp.maximum(x @ w1 + b1, 0.0)
    z = h @ w2 + b2
    h2 = jnp.maximum(z @ w3 + b3, 0.0)
    return h2 @ w4 + b4


def _reference_bf16(x, params):
    """Matches the kernel's numerics exactly: same fused W23/b23, bf16 dot inputs, f32 accumulate."""
    bf16 = jnp.bfloat16
    w1b, b1f, w23b, b23f, w4b, b4f = _prepare_params(params)

    def lin(a, w, b):
        return jnp.dot(a.astype(bf16), w, preferred_element_type=jnp.float32) + b

    h = jnp.maximum(lin(x, w1b, b1f), 0.0)
    h2 = jnp.maximum(lin(h, w23b, b23f), 0.0)
    return lin(h2, w4b, b4f)


if __name__ == "__main__":
    key = jax.random.PRNGKey(0)
    k_x, k_p = jax.random.split(key)

    B = 8
    x = jax.random.normal(k_x, (B, D_IN), jnp.float32)
    params = init_params(k_p)

    out = autoencoder_forward(x, params)
    out = jax.block_until_ready(out)
    assert out.shape == (B, D_OUT), out.shape

    # Tight check against a reference with identical fused / bf16-matmul / f32-accumulate numerics.
    ref_bf16 = _reference_bf16(x, params)
    assert jnp.allclose(out, ref_bf16, atol=2e-3, rtol=2e-3), \
        "mismatch vs bf16-matmul JAX reference"

    # Loose sanity check against the pure-f32 PyTorch-equivalent forward.
    ref_f32 = _reference_f32(x, params)
    assert jnp.allclose(out, ref_f32, atol=1e-1, rtol=1e-1), \
        "mismatch vs f32 JAX reference"

    print("KERNEL_OK")
</pallas_src>

<mosaic_0001>
module attributes {stable_mosaic.version = 11 : i64} {
  func.func @_autoencoder_kernel(%arg0: i32, %arg1: memref<16x310xbf16, #tpu.memory_space<vmem>>, %arg2: memref<310x256xbf16, #tpu.memory_space<vmem>>, %arg3: memref<1x256xf32, #tpu.memory_space<vmem>>, %arg4: memref<256x256xbf16, #tpu.memory_space<vmem>>, %arg5: memref<1x256xf32, #tpu.memory_space<vmem>>, %arg6: memref<256x310xbf16, #tpu.memory_space<vmem>>, %arg7: memref<1x310xf32, #tpu.memory_space<vmem>>, %arg8: memref<16x310xf32, #tpu.memory_space<vmem>>) attributes {dimension_semantics = [#tpu.dimension_semantics<parallel>], iteration_bounds = array<i64: 1>, scalar_prefetch = 0 : i64, scratch_operands = 0 : i64, tpu.core_type = #tpu.core_type<tc>, window_params = [{transform_indices = @transform_0, window_bounds = array<i64: 16, 310>}, {pipeline_mode = #tpu.pipeline_mode<synchronous>, transform_indices = @transform_1, window_bounds = array<i64: 310, 256>}, {pipeline_mode = #tpu.pipeline_mode<synchronous>, transform_indices = @transform_2, window_bounds = array<i64: 1, 256>}, {pipeline_mode = #tpu.pipeline_mode<synchronous>, transform_indices = @transform_3, window_bounds = array<i64: 256, 256>}, {pipeline_mode = #tpu.pipeline_mode<synchronous>, transform_indices = @transform_4, window_bounds = array<i64: 1, 256>}, {pipeline_mode = #tpu.pipeline_mode<synchronous>, transform_indices = @transform_5, window_bounds = array<i64: 256, 310>}, {pipeline_mode = #tpu.pipeline_mode<synchronous>, transform_indices = @transform_6, window_bounds = array<i64: 1, 310>}, {transform_indices = @transform_7, window_bounds = array<i64: 16, 310>}]} {
    %c0 = arith.constant 0 : index
    %c0_0 = arith.constant 0 : index
    %0 = vector.load %arg1[%c0, %c0_0] : memref<16x310xbf16, #tpu.memory_space<vmem>>, vector<16x310xbf16>
    %c0_1 = arith.constant 0 : index
    %c0_2 = arith.constant 0 : index
    %1 = vector.load %arg2[%c0_1, %c0_2] : memref<310x256xbf16, #tpu.memory_space<vmem>>, vector<310x256xbf16>
    %cst = arith.constant dense<0.000000e+00> : vector<16x256xf32>
    %2 = tpu.matmul %0, %1, %cst {dimension_numbers = #tpu.dot_dimension_numbers<[1], [0], [0], [1], [0, 0, 1, 1], [], []>} : vector<16x310xbf16>, vector<310x256xbf16>, vector<16x256xf32> -> vector<16x256xf32>
    %c0_3 = arith.constant 0 : index
    %c0_4 = arith.constant 0 : index
    %3 = vector.load %arg3[%c0_3, %c0_4] : memref<1x256xf32, #tpu.memory_space<vmem>>, vector<1x256xf32>
    %4 = vector.broadcast %3 : vector<1x256xf32> to vector<16x256xf32>
    %5 = arith.addf %2, %4 : vector<16x256xf32>
    %cst_5 = arith.constant 0.000000e+00 : f32
    %6 = vector.broadcast %cst_5 : f32 to vector<16x256xf32>
    %7 = arith.maximumf %5, %6 : vector<16x256xf32>
    %8 = arith.truncf %7 : vector<16x256xf32> to vector<16x256xbf16>
    %c0_6 = arith.constant 0 : index
    %c0_7 = arith.constant 0 : index
    %9 = vector.load %arg4[%c0_6, %c0_7] : memref<256x256xbf16, #tpu.memory_space<vmem>>, vector<256x256xbf16>
    %cst_8 = arith.constant dense<0.000000e+00> : vector<16x256xf32>
    %10 = tpu.matmul %8, %9, %cst_8 {dimension_numbers = #tpu.dot_dimension_numbers<[1], [0], [0], [1], [0, 0, 1, 1], [], []>} : vector<16x256xbf16>, vector<256x256xbf16>, vector<16x256xf32> -> vector<16x256xf32>
    %c0_9 = arith.constant 0 : index
    %c0_10 = arith.constant 0 : index
    %11 = vector.load %arg5[%c0_9, %c0_10] : memref<1x256xf32, #tpu.memory_space<vmem>>, vector<1x256xf32>
    %12 = vector.broadcast %11 : vector<1x256xf32> to vector<16x256xf32>
    %13 = arith.addf %10, %12 : vector<16x256xf32>
    %cst_11 = arith.constant 0.000000e+00 : f32
    %14 = vector.broadcast %cst_11 : f32 to vector<16x256xf32>
    %15 = arith.maximumf %13, %14 : vector<16x256xf32>
    %16 = arith.truncf %15 : vector<16x256xf32> to vector<16x256xbf16>
    %c0_12 = arith.constant 0 : index
    %c0_13 = arith.constant 0 : index
    %17 = vector.load %arg6[%c0_12, %c0_13] : memref<256x310xbf16, #tpu.memory_space<vmem>>, vector<256x310xbf16>
    %cst_14 = arith.constant dense<0.000000e+00> : vector<16x310xf32>
    %18 = tpu.matmul %16, %17, %cst_14 {dimension_numbers = #tpu.dot_dimension_numbers<[1], [0], [0], [1], [0, 0, 1, 1], [], []>} : vector<16x256xbf16>, vector<256x310xbf16>, vector<16x310xf32> -> vector<16x310xf32>
    %c0_15 = arith.constant 0 : index
    %c0_16 = arith.constant 0 : index
    %19 = vector.load %arg7[%c0_15, %c0_16] : memref<1x310xf32, #tpu.memory_space<vmem>>, vector<1x310xf32>
    %20 = vector.broadcast %19 : vector<1x310xf32> to vector<16x310xf32>
    %21 = arith.addf %18, %20 : vector<16x310xf32>
    %c0_17 = arith.constant 0 : index
    %c0_18 = arith.constant 0 : index
    %22 = vector.load %arg8[%c0_17, %c0_18] : memref<16x310xf32, #tpu.memory_space<vmem>>, vector<16x310xf32>
    tpu.vector_store %arg8[%c0_17, %c0_18], %21 {strides = array<i32>} : memref<16x310xf32, #tpu.memory_space<vmem>>, vector<16x310xf32>,
    return
  }
  func.func @transform_0(%arg0: i32) -> (i32, i32) {
    %c0_i32 = arith.constant 0 : i32
    %c0_i32_0 = arith.constant 0 : i32
    return %arg0, %c0_i32 : i32, i32
  }
  func.func @transform_1(%arg0: i32) -> (i32, i32) {
    %c0_i32 = arith.constant 0 : i32
    %c0_i32_0 = arith.constant 0 : i32
    %c0_i32_1 = arith.constant 0 : i32
    return %c0_i32, %c0_i32_0 : i32, i32
  }
  func.func @transform_2(%arg0: i32) -> (i32, i32) {
    %c0_i32 = arith.constant 0 : i32
    %c0_i32_0 = arith.constant 0 : i32
    %c0_i32_1 = arith.constant 0 : i32
    return %c0_i32, %c0_i32_0 : i32, i32
  }
  func.func @transform_3(%arg0: i32) -> (i32, i32) {
    %c0_i32 = arith.constant 0 : i32
    %c0_i32_0 = arith.constant 0 : i32
    %c0_i32_1 = arith.constant 0 : i32
    return %c0_i32, %c0_i32_0 : i32, i32
  }
  func.func @transform_4(%arg0: i32) -> (i32, i32) {
    %c0_i32 = arith.constant 0 : i32
    %c0_i32_0 = arith.constant 0 : i32
    %c0_i32_1 = arith.constant 0 : i32
    return %c0_i32, %c0_i32_0 : i32, i32
  }
  func.func @transform_5(%arg0: i32) -> (i32, i32) {
    %c0_i32 = arith.constant 0 : i32
    %c0_i32_0 = arith.constant 0 : i32
    %c0_i32_1 = arith.constant 0 : i32
    return %c0_i32, %c0_i32_0 : i32, i32
  }
  func.func @transform_6(%arg0: i32) -> (i32, i32) {
    %c0_i32 = arith.constant 0 : i32
    %c0_i32_0 = arith.constant 0 : i32
    %c0_i32_1 = arith.constant 0 : i32
    return %c0_i32, %c0_i32_0 : i32, i32
  }
  func.func @transform_7(%arg0: i32) -> (i32, i32) {
    %c0_i32 = arith.constant 0 : i32
    %c0_i32_0 = arith.constant 0 : i32
    return %arg0, %c0_i32 : i32, i32
  }
}

</mosaic_0001>

<bundles_post_ra>
// kernel: tpu_custom_call.1
= control target key start
LH: loop header
LB: loop body
LE: loop exit
PB: predicated region body
PF: predicated region fallthrough
CT: control target
= control target key end

     0   :  { %12 = vsyncpa [#allocation3], 0  ;;  %v1450_v60 = vmov 0   ;;  %vm297_vm0 = vcmask 1042432   ;;  %vm293_vm1 = vcmask 441344   ;;  %s1899_s0 = inlined_call_operand.vmem [shape: bf16[8,310], index: 0, kind: input, shape index: {}]   ;;  %s1900_s1 = inlined_call_operand.vmem [shape: bf16[310,256], index: 1, kind: input, shape index: {}]   ;;  %s1901_s2 = inlined_call_operand.vmem [shape: f32[1,256], index: 2, kind: input, shape index: {}]   ;;  %s1902_s3 = inlined_call_operand.vmem [shape: bf16[256,256], index: 3, kind: input, shape index: {}]   ;;  %s1903_s4 = inlined_call_operand.vmem [shape: f32[1,256], index: 4, kind: input, shape index: {}]   ;;  %s1904_s5 = inlined_call_operand.vmem [shape: bf16[256,310], index: 5, kind: input, shape index: {}]   ;;  %s1905_s6 = inlined_call_operand.vmem [shape: f32[1,310], index: 6, kind: input, shape index: {}]   ;;  %s1906_s7 = inlined_call_operand.hbm [shape: f32[8,310], index: 7, kind: output, shape index: {}]  }
   0x1   :  { %v1251_v0 = vld [vmem:[%s1900_s1 + $0x4] ss:$8 sps:$4 sm:$0xff]   ;;  %v1253_v1 = vld [vmem:[%s1900_s1] ss:$8 sps:$4 sm:$0xff]   ;;  %v1254_v2 = vld [vmem:[%s1900_s1 + $0x14] ss:$8 sps:$4 sm:$0xff]  }
   0x2   :  { %304 = vmatprep.subr.bf16.mxu0 %v1251_v0  ;;  %v1256_v3 = vld [vmem:[%s1900_s1 + $0x10] ss:$8 sps:$4 sm:$0xff]   ;;  %v1257_v4 = vld [vmem:[%s1900_s1 + $0x24] ss:$8 sps:$4 sm:$0xff]   ;;  %v1259_v5 = vld [vmem:[%s1900_s1 + $0x20] ss:$8 sps:$4 sm:$0xff]  }
   0x3   :  { %305 = vmatpush1.bf16.msra.mxu0 %v1253_v1  ;;  %v1260_v6 = vld [vmem:[%s1900_s1 + $0x34] ss:$8 sps:$4 sm:$0xff]   ;;  %v1262_v7 = vld [vmem:[%s1900_s1 + $0x30] ss:$8 sps:$4 sm:$0xff]   ;;  %v1263_v8 = vld [vmem:[%s1900_s1 + $0x44] ss:$8 sps:$4 sm:$0xff]  }
   0x4   :  { %306 = vmatprep.subr.bf16.mxu0 %v1254_v2  ;;  %v1265_v9 = vld [vmem:[%s1900_s1 + $0x40] ss:$8 sps:$4 sm:$0xff]   ;;  %v1266_v10 = vld [vmem:[%s1900_s1 + $0x54] ss:$8 sps:$4 sm:$0xff]   ;;  %v1268_v11 = vld [vmem:[%s1900_s1 + $0x50] ss:$8 sps:$4 sm:$0xff]  }
   0x5   :  { %v1269_v12 = vld [vmem:[%s1900_s1 + $0x64] ss:$8 sps:$4 sm:$0xff]   ;;  %v1271_v14 = vld [vmem:[%s1900_s1 + $0x60] ss:$8 sps:$4 sm:$0xff]   ;;  %v1272_v15 = vld [vmem:[%s1900_s1 + $0x74] ss:$8 sps:$4 sm:$0xff]  }
   0x6   :  { %v1301_v13 = vld [vmem:[%s1899_s0 + $0x4] ss:$12 sps:$4 sm:$0xff]   ;;  %v1316_v19 = vld [vmem:[%s1902_s3] ss:$8 sps:$4 sm:$0xff]   ;;  %v1317_v20 = vld [vmem:[%s1902_s3 + $0x14] ss:$8 sps:$4 sm:$0xff]  }
   0x7   :  { %307 = vmatpush1.bf16.msra.mxu0 %v1256_v3  ;;  %336 = vmatprep.mubr.bf16.mxu0 %v1301_v13  ;;  %v1274_v16 = vld [vmem:[%s1900_s1 + $0x70] ss:$8 sps:$4 sm:$0xff]   ;;  %v1275_v17 = vld [vmem:[%s1900_s1 + $0x84] ss:$8 sps:$4 sm:$0xff]   ;;  %v1277_v21 = vld [vmem:[%s1900_s1 + $0x80] ss:$8 sps:$4 sm:$0xff]  }
   0x8   :  { %308 = vmatprep.subr.bf16.mxu0 %v1257_v4  ;;  %v1314_v18 = vld [vmem:[%s1902_s3 + $0x4] ss:$8 sps:$4 sm:$0xff]   ;;  %v1319_v22 = vld [vmem:[%s1902_s3 + $0x10] ss:$8 sps:$4 sm:$0xff]   ;;  %v1278_v23 = vld [vmem:[%s1900_s1 + $0x94] ss:$8 sps:$4 sm:$0xff]  }
   0x9   :  { %600 = vmatprep.subr.bf16.mxu1 %v1314_v18  ;;  %v1320_v24 = vld [vmem:[%s1902_s3 + $0x24] ss:$8 sps:$4 sm:$0xff]   ;;  %v1280_v25 = vld [vmem:[%s1900_s1 + $0x90] ss:$8 sps:$4 sm:$0xff]   ;;  %v1322_v26 = vld [vmem:[%s1902_s3 + $0x20] ss:$8 sps:$4 sm:$0xff]  }
   0xa   :  { %601 = vmatpush1.bf16.msra.mxu1 %v1316_v19  ;;  %v1281_v27 = vld [vmem:[%s1900_s1 + $0xa4] ss:$8 sps:$4 sm:$0xff]   ;;  %v1323_v28 = vld [vmem:[%s1902_s3 + $0x34] ss:$8 sps:$4 sm:$0xff]   ;;  %v1283_v29 = vld [vmem:[%s1900_s1 + $0xa0] ss:$8 sps:$4 sm:$0xff]  }
   0xb   :  { %309 = vmatpush1.bf16.msra.mxu0 %v1259_v5  ;;  %602 = vmatprep.subr.bf16.mxu1 %v1317_v20  ;;  %v1325_v30 = vld [vmem:[%s1902_s3 + $0x30] ss:$8 sps:$4 sm:$0xff]   ;;  %v1284_v31 = vld [vmem:[%s1900_s1 + $0xb4] ss:$8 sps:$4 sm:$0xff]   ;;  %v1326_v32 = vld [vmem:[%s1902_s3 + $0x44] ss:$8 sps:$4 sm:$0xff]  }
   0xc   :  { %310 = vmatprep.subr.bf16.mxu0 %v1260_v6  ;;  %v1286_v33 = vld [vmem:[%s1900_s1 + $0xb0] ss:$8 sps:$4 sm:$0xff]   ;;  %v1328_v34 = vld [vmem:[%s1902_s3 + $0x40] ss:$8 sps:$4 sm:$0xff]   ;;  %v1287_v35 = vld [vmem:[%s1900_s1 + $0xc4] ss:$8 sps:$4 sm:$0xff]  }
   0xd   :  { %v1329_v36 = vld [vmem:[%s1902_s3 + $0x54] ss:$8 sps:$4 sm:$0xff]   ;;  %v1289_v37 = vld [vmem:[%s1900_s1 + $0xc0] ss:$8 sps:$4 sm:$0xff]   ;;  %v1331_v38 = vld [vmem:[%s1902_s3 + $0x50] ss:$8 sps:$4 sm:$0xff]  }
   0xe   :  { %603 = vmatpush1.bf16.msra.mxu1 %v1319_v22  ;;  %v1290_v39 = vld [vmem:[%s1900_s1 + $0xd4] ss:$8 sps:$4 sm:$0xff]   ;;  %v1332_v40 = vld [vmem:[%s1902_s3 + $0x64] ss:$8 sps:$4 sm:$0xff]   ;;  %v1292_v41 = vld [vmem:[%s1900_s1 + $0xd0] ss:$8 sps:$4 sm:$0xff]  }
   0xf   :  { %311 = vmatpush1.bf16.msra.mxu0 %v1262_v7  ;;  %604 = vmatprep.subr.bf16.mxu1 %v1320_v24  ;;  %v1334_v42 = vld [vmem:[%s1902_s3 + $0x60] ss:$8 sps:$4 sm:$0xff]   ;;  %v1293_v43 = vld [vmem:[%s1900_s1 + $0xe4] ss:$8 sps:$4 sm:$0xff]   ;;  %v1335_v44 = vld [vmem:[%s1902_s3 + $0x74] ss:$8 sps:$4 sm:$0xff]  }
  0x10   :  { %312 = vmatprep.subr.bf16.mxu0 %v1263_v8  ;;  %v1295_v45 = vld [vmem:[%s1900_s1 + $0xe0] ss:$8 sps:$4 sm:$0xff]   ;;  %v1337_v46 = vld [vmem:[%s1902_s3 + $0x70] ss:$8 sps:$4 sm:$0xff]   ;;  %v1296_v47 = vld [vmem:[%s1900_s1 + $0xf4] ss:$8 sps:$4 sm:$0xff]  }
  0x11   :  { %v1338_v48 = vld [vmem:[%s1902_s3 + $0x84] ss:$8 sps:$4 sm:$0xff]   ;;  %v1298_v49 = vld [vmem:[%s1900_s1 + $0xf0] ss:$8 sps:$4 sm:$0xff]   ;;  %v1340_v50 = vld [vmem:[%s1902_s3 + $0x80] ss:$8 sps:$4 sm:$0xff]  }
  0x12   :  { %605 = vmatpush1.bf16.msra.mxu1 %v1322_v26  ;;  %v1304_v51 = vld [vmem:[%s1900_s1 + $0x104] ss:$8 sps:$4 sm:$0xff]   ;;  %v1341_v52 = vld [vmem:[%s1902_s3 + $0x94] ss:$8 sps:$4 sm:$0xff]   ;;  %v1302_v54 = vld [vmem:[%s1900_s1 + $0x100] ss:$8 sps:$4 sm:$0xff]   ;;  %v73_v26 = vlaneseq }
  0x13   :  { %313 = vmatpush1.bf16.msra.mxu0 %v1265_v9  ;;  %606 = vmatprep.subr.bf16.mxu1 %v1323_v28  ;;  %v1299_v53 = vld [vmem:[%s1899_s0] ss:$12 sps:$4 sm:$0xff]   ;;  %v1307_v55 = vld [vmem:[%s1900_s1 + $0x114] ss:$8 sps:$4 sm:$0xff]   ;;  %v1343_v56 = vld [vmem:[%s1902_s3 + $0x90] ss:$8 sps:$4 sm:$0xff]  }
  0x14   :  { %314 = vmatprep.subr.bf16.mxu0 %v1266_v10  ;;  %v1344_v57 = vld [vmem:[%s1902_s3 + $0xa4] ss:$8 sps:$4 sm:$0xff]   ;;  %v1305_v58 = vld [vmem:[%s1900_s1 + $0x110] ss:$8 sps:$4 sm:$0xff]   ;;  %v1346_v61 = vld [vmem:[%s1902_s3 + $0xa0] ss:$8 sps:$4 sm:$0xff]  }
  0x15   :  { %v1310_v59 = vld [vmem:[%s1900_s1 + $0x124] ss:$8 sps:$4 sm:$0xff]   ;;  %v70_v62 = vld [vmem:[%s1900_s1 + $0x130] sm:$0x77]  ;;  %v1308_v0 = vld [vmem:[%s1900_s1 + $0x120] ss:$8 sps:$4 sm:$0xff]  }
  0x16   :  { %607 = vmatpush1.bf16.msra.mxu1 %v1325_v30  ;;  %v1347_v63 = vld [vmem:[%s1902_s3 + $0xb4] ss:$8 sps:$4 sm:$0xff]   ;;  %v1134_v1 = vcombine.high %v70_v62, %v70_v62  ;;  %v1133_v2 = vcombine.low %v70_v62, %v70_v62  ;;  %v1349_v3 = vld [vmem:[%s1902_s3 + $0xb0] ss:$8 sps:$4 sm:$0xff]   ;;  %v1350_v4 = vld [vmem:[%s1902_s3 + $0xc4] ss:$8 sps:$4 sm:$0xff]  }
  0x17   :  { %315 = vmatpush1.bf16.msra.mxu0 %v1268_v11  ;;  %608 = vmatprep.subr.bf16.mxu1 %v1326_v32  ;;  %v1352_v6 = vld [vmem:[%s1902_s3 + $0xc0] ss:$8 sps:$4 sm:$0xff]   ;;  %v1353_v7 = vld [vmem:[%s1902_s3 + $0xd4] ss:$8 sps:$4 sm:$0xff]   ;;  %v1355_v9 = vld [vmem:[%s1902_s3 + $0xd0] ss:$8 sps:$4 sm:$0xff]  }
  0x18   :  { %316 = vmatprep.subr.bf16.mxu0 %v1269_v12  ;;  %v299_v5 = vsel %vm297_vm0, %v1133_v2, 0  ;;  %v1313_v8 = vld [vmem:[%s1899_s0 + $0x8] ss:$12 sps:$4 sm:$0xff]   ;;  %v1356_v10 = vld [vmem:[%s1902_s3 + $0xe4] ss:$8 sps:$4 sm:$0xff]  }
  0x19   :  { %v1358_v11 = vld [vmem:[%s1902_s3 + $0xe0] ss:$8 sps:$4 sm:$0xff]   ;;  %v1359_v12 = vld [vmem:[%s1902_s3 + $0xf4] ss:$8 sps:$4 sm:$0xff]   ;;  %v1361_v13 = vld [vmem:[%s1902_s3 + $0xf0] ss:$8 sps:$4 sm:$0xff]  }
  0x1a   :  { %609 = vmatpush1.bf16.msra.mxu1 %v1328_v34  ;;  %v1395_v18 = vld [vmem:[%s1904_s5 + $0x20] ss:$12 sps:$4 sm:$0xff]   ;;  %v1399_v19 = vld [vmem:[%s1904_s5 + $0xf8] ss:$12 sps:$4 sm:$0xff]   ;;  %v1405_v22 = vld [vmem:[%s1904_s5 + $0x50] ss:$12 sps:$4 sm:$0xff]  }
  0x1b   :  { %317 = vmatpush1.bf16.msra.mxu0 %v1271_v14  ;;  %610 = vmatprep.subr.bf16.mxu1 %v1329_v36  ;;  %v1364_v14 = vld [vmem:[%s1904_s5 + $0x4] ss:$12 sps:$4 sm:$0xff]   ;;  %v1410_v24 = vld [vmem:[%s1904_s5 + $0x68] ss:$12 sps:$4 sm:$0xff]  }
  0x1c   :  { %318 = vmatprep.subr.bf16.mxu0 %v1272_v15  ;;  %v1389_v15 = vld [vmem:[%s1904_s5 + $0xc8] ss:$12 sps:$4 sm:$0xff]   ;;  %v1400_v20 = vld [vmem:[%s1904_s5 + $0x38] ss:$12 sps:$4 sm:$0xff]  }
  0x1d   :  { %v1388_v62 = vld [vmem:[%s1904_s5 + $0xc4] ss:$12 sps:$4 sm:$0xff]   ;;  %v1398_v2 = vld [vmem:[%s1904_s5 + $0xf4] ss:$12 sps:$4 sm:$0xff]  }
  0x1e   :  { %611 = vmatpush1.bf16.msra.mxu1 %v1331_v38 }
  0x1f   :  { %319 = vmatpush1.bf16.msra.mxu0 %v1274_v16  ;;  %612 = vmatprep.subr.bf16.mxu1 %v1332_v40  ;;  %v1390_v16 = vld [vmem:[%s1904_s5 + $0x8] ss:$12 sps:$4 sm:$0xff]  }
  0x20   :  { %320 = vmatprep.subr.bf16.mxu0 %v1275_v17  ;;  %v1394_v17 = vld [vmem:[%s1904_s5 + $0xe0] ss:$12 sps:$4 sm:$0xff]  }
  0x22   :  { %613 = vmatpush1.bf16.msra.mxu1 %v1334_v42 }
  0x23   :  { %321 = vmatpush1.bf16.msra.mxu0 %v1277_v21  ;;  %614 = vmatprep.subr.bf16.mxu1 %v1335_v44  ;;  %v1404_v21 = vld [vmem:[%s1904_s5 + $0x110] ss:$12 sps:$4 sm:$0xff]  }
  0x24   :  { %322 = vmatprep.subr.bf16.mxu0 %v1278_v23  ;;  %v1409_v23 = vld [vmem:[%s1904_s5 + $0x128] ss:$12 sps:$4 sm:$0xff]  }
  0x26   :  { %615 = vmatpush1.bf16.msra.mxu1 %v1337_v46 }
  0x27   :  { %323 = vmatpush1.bf16.msra.mxu0 %v1280_v25  ;;  %616 = vmatprep.subr.bf16.mxu1 %v1338_v48  ;;  %v1414_v25 = vld [vmem:[%s1904_s5 + $0x140] ss:$12 sps:$4 sm:$0xff]   ;;  %v1367_v48 = vld [vmem:[%s1904_s5 + $0x1c] ss:$12 sps:$4 sm:$0xff]  }
  0x28   :  { %324 = vmatprep.subr.bf16.mxu0 %v1281_v27  ;;  %v1753_v27 = vshrl.u32 %v73_v26, 7 }
  0x2a   :  { %617 = vmatpush1.bf16.msra.mxu1 %v1340_v50  ;;  %v1756_v28 = vsub.s32 0, %v1753_v27  ;;  %v1762_v30 = vsub.s32 1, %v1753_v27  ;;  %v1370_v50 = vld [vmem:[%s1904_s5 + $0x34] ss:$12 sps:$4 sm:$0xff]  }
  0x2b   :  { %325 = vmatpush1.bf16.msra.mxu0 %v1283_v29  ;;  %618 = vmatprep.subr.bf16.mxu1 %v1341_v52  ;;  %v71_v29 = vld [vmem:[%s1901_s2] sm:$0x3]  ;;  %v1373_v52 = vld [vmem:[%s1904_s5 + $0x4c] ss:$12 sps:$4 sm:$0xff]  }
  0x2c   :  { %326 = vmatprep.subr.bf16.mxu0 %v1284_v31  ;;  %v76_v31 = vrot.slane %v71_v29, %v1756_v28  ;;  %v80_v32 = vrot.slane %v71_v29, %v1762_v30 }
  0x2e   :  { %619 = vmatpush1.bf16.msra.mxu1 %v1343_v56  ;;  %v1379_v56 = vld [vmem:[%s1904_s5 + $0x7c] ss:$12 sps:$4 sm:$0xff]  }
  0x2f   :  { %327 = vmatpush1.bf16.msra.mxu0 %v1286_v33  ;;  %620 = vmatprep.subr.bf16.mxu1 %v1344_v57  ;;  %v1377_v57 = vld [vmem:[%s1904_s5 + $0x78] ss:$12 sps:$4 sm:$0xff]  }
  0x30   :  { %328 = vmatprep.subr.bf16.mxu0 %v1287_v35 }
  0x32   :  { %621 = vmatpush1.bf16.msra.mxu1 %v1346_v61  ;;  %v1383_v61 = vld [vmem:[%s1904_s5 + $0xa8] ss:$12 sps:$4 sm:$0xff]  }
  0x33   :  { %329 = vmatpush1.bf16.msra.mxu0 %v1289_v37  ;;  %622 = vmatprep.subr.bf16.mxu1 %v1347_v63  ;;  %v1386_v63 = vld [vmem:[%s1904_s5 + $0xc0] ss:$12 sps:$4 sm:$0xff]  }
  0x34   :  { %330 = vmatprep.subr.bf16.mxu0 %v1290_v39 }
  0x36   :  { %623 = vmatpush1.bf16.msra.mxu1 %v1349_v3  ;;  %v1396_v3 = vld [vmem:[%s1904_s5 + $0xf0] ss:$12 sps:$4 sm:$0xff]  }
  0x37   :  { %331 = vmatpush1.bf16.msra.mxu0 %v1292_v41  ;;  %624 = vmatprep.subr.bf16.mxu1 %v1350_v4  ;;  %v1403_v4 = vld [vmem:[%s1904_s5 + $0x10c] ss:$12 sps:$4 sm:$0xff]  }
  0x38   :  { %332 = vmatprep.subr.bf16.mxu0 %v1293_v43 }
  0x3a   :  { %625 = vmatpush1.bf16.msra.mxu1 %v1352_v6  ;;  %v1408_v6 = vld [vmem:[%s1904_s5 + $0x124] ss:$12 sps:$4 sm:$0xff]  }
  0x3b   :  { %333 = vmatpush1.bf16.msra.mxu0 %v1295_v45  ;;  %626 = vmatprep.subr.bf16.mxu1 %v1353_v7  ;;  %v1406_v7 = vld [vmem:[%s1904_s5 + $0x120] ss:$12 sps:$4 sm:$0xff]  }
  0x3c   :  { %334 = vmatprep.subr.bf16.mxu0 %v1296_v47  ;;  %v1362_v47 = vld [vmem:[%s1904_s5] ss:$12 sps:$4 sm:$0xff]  }
  0x3e   :  { %627 = vmatpush1.bf16.msra.mxu1 %v1355_v9  ;;  %v1411_v9 = vld [vmem:[%s1904_s5 + $0x138] ss:$12 sps:$4 sm:$0xff]  }
  0x3f   :  { %335 = vmatpush1.bf16.msra.mxu0 %v1298_v49  ;;  %628 = vmatprep.subr.bf16.mxu1 %v1356_v10  ;;  %v1365_v49 = vld [vmem:[%s1904_s5 + $0x18] ss:$12 sps:$4 sm:$0xff]   ;;  %v1415_v10 = vld [vmem:[%s1904_s5 + $0x80] ss:$12 sps:$4 sm:$0xff]  }
  0x40   :  { %347 = vmatprep.subr.bf16.mxu0 %v1304_v51  ;;  %v1368_v51 = vld [vmem:[%s1904_s5 + $0x30] ss:$12 sps:$4 sm:$0xff]  }
  0x42   :  { %337 = vmatmul.mubr.bf16.vlgmr.msra.gmra.mrb[0].mxu0 %v1299_v53  ;;  %629 = vmatpush1.bf16.msra.mxu1 %v1358_v11  ;;  %v1371_v53 = vld [vmem:[%s1904_s5 + $0x48] ss:$12 sps:$4 sm:$0xff]  }
  0x43   :  { %348 = vmatpush1.bf16.msra.mxu0 %v1302_v54  ;;  %379 = vmatprep.mubr.bf16.mxu0 %v1450_v60  ;;  %v1376_v54 = vld [vmem:[%s1904_s5 + $0x64] ss:$12 sps:$4 sm:$0xff]   ;;  %v1385_v60 = vld [vmem:[%s1904_s5 + $0xac] ss:$12 sps:$4 sm:$0xff]   ;;  %v1418_v11 = vld [vmem:[%s1904_s5 + $0x154] ss:$12 sps:$4 sm:$0xff]  }
  0x44   :  { %349 = vmatprep.subr.bf16.mxu0 %v1307_v55  ;;  %630 = vmatprep.subr.bf16.mxu1 %v1359_v12  ;;  %v1374_v55 = vld [vmem:[%s1904_s5 + $0x60] ss:$12 sps:$4 sm:$0xff]   ;;  %v1419_v12 = vld [vmem:[%s1904_s5 + $0x158] ss:$12 sps:$4 sm:$0xff]  }
  0x46   :  { %631 = vmatpush1.bf16.msra.mxu1 %v1361_v13  ;;  %v1416_v13 = vld [vmem:[%s1904_s5 + $0x150] ss:$12 sps:$4 sm:$0xff]  }
  0x47   :  { %350 = vmatpush1.bf16.msra.mxu0 %v1305_v58  ;;  %986 = vmatprep.subr.bf16.mxu1 %v1364_v14  ;;  %v1382_v58 = vld [vmem:[%s1904_s5 + $0x94] ss:$12 sps:$4 sm:$0xff]   ;;  %v1420_v14 = vld [vmem:[%s1904_s5 + $0x98] ss:$12 sps:$4 sm:$0xff]  }
  0x48   :  { %351 = vmatprep.subr.bf16.mxu0 %v1310_v59  ;;  %v1380_v59 = vld [vmem:[%s1904_s5 + $0x90] ss:$12 sps:$4 sm:$0xff]  }
  0x4b   :  { %352 = vmatpush1.bf16.msra.mxu0 %v1308_v0  ;;  %v1393_v0 = vld [vmem:[%s1904_s5 + $0xdc] ss:$12 sps:$4 sm:$0xff]  }
  0x4c   :  { %1135 = vmatprep.subr.msk.bf16.mxu0 %vm297_vm0, %v1134_v1  ;;  %v1391_v1 = vld [vmem:[%s1904_s5 + $0xd8] ss:$12 sps:$4 sm:$0xff]  }
  0x4f   :  { %354 = vmatpush1.bf16.msra.mxu0 %v299_v5  ;;  %v1401_v5 = vld [vmem:[%s1904_s5 + $0x108] ss:$12 sps:$4 sm:$0xff]  }
  0x50   :  { %1217 = vmatprep.subr.bf16.mxu0 %v1389_v15  ;;  %v1423_v15 = vld [vmem:[%s1904_s5 + $0x16c] ss:$12 sps:$4 sm:$0xff]  }
  0x52   :  { %1136 = vmatmul.mubr.msk.bf16.vlgmr.msra.gmra.mrb[0].mxu0 %vm293_vm1, %v1313_v8  ;;  %v1413_v8 = vld [vmem:[%s1904_s5 + $0x13c] ss:$12 sps:$4 sm:$0xff]  }
  0x53   :  { %1218 = vmatpush3.bf16.msra.mxu0 %v1390_v16  ;;  %v1424_v16 = vld [vmem:[%s1904_s5 + $0x170] ss:$12 sps:$4 sm:$0xff]  }
  0x54   :  { %1219 = vmatprep.subr.bf16.mxu0 %v1394_v17  ;;  %v1421_v17 = vld [vmem:[%s1904_s5 + $0x168] ss:$12 sps:$4 sm:$0xff]  }
  0x57   :  { %1220 = vmatpush3.bf16.msra.mxu0 %v1395_v18  ;;  %v1425_v18 = vld [vmem:[%s1904_s5 + $0xb0] ss:$12 sps:$4 sm:$0xff]  }
  0x58   :  { %1221 = vmatprep.subr.bf16.mxu0 %v1399_v19  ;;  %v428_v19 = vld [vmem:[%s1903_s4] sm:$0x3] }
  0x5b   :  { %1222 = vmatpush3.bf16.msra.mxu0 %v1400_v20  ;;  %v433_v20 = vrot.slane %v428_v19, %v1756_v28 }
  0x5c   :  { %1223 = vmatprep.subr.bf16.mxu0 %v1404_v21  ;;  %v437_v21 = vrot.slane %v428_v19, %v1762_v30 }
  0x5f   :  { %1224 = vmatpush3.bf16.msra.mxu0 %v1405_v22 }
  0x60   :  { %1225 = vmatprep.subr.bf16.mxu0 %v1409_v23 }
  0x63   :  { %1226 = vmatpush3.bf16.msra.mxu0 %v1410_v24 }
  0x64   :  { %1227 = vmatprep.subr.bf16.mxu0 %v1414_v25 }
  0x67   :  { %1228 = vmatpush3.bf16.msra.mxu0 %v1415_v10 }
  0x68   :  { %1229 = vmatprep.subr.bf16.mxu0 %v1419_v12 }
  0x6b   :  { %1230 = vmatpush3.bf16.msra.mxu0 %v1420_v14 }
  0x6c   :  { %1231 = vmatprep.subr.bf16.mxu0 %v1424_v16 }
  0x6f   :  { %1232 = vmatpush3.bf16.msra.mxu0 %v1425_v18 }
 0x125   :  { %v381_v33 = vpop.f32.mrb[0].mxu0 }
 0x126   :  { %v1239_v34 = vadd.f32 %v381_v33, %v76_v31  ;;  %v383_v35 = vpop.f32.mrb[1].mxu0 }
 0x127   :  { %v1240_v36 = vadd.f32 %v383_v35, %v80_v32  ;;  %v385_v37 = vpop.f32.mrb[2].mxu0 }
 0x128   :  { %v1241_v38 = vadd.f32 %v385_v37, %v76_v31  ;;  %v387_v39 = vpop.f32.mrb[3].mxu0  ;;  %v390_v41 = vmax.f32 %v1239_v34, 0.0 }
 0x129   :  { %v1242_v40 = vadd.f32 %v387_v39, %v80_v32  ;;  %v391_v43 = vmax.f32 %v1240_v36, 0.0  ;;  %v713_v39 = vld [vmem:[%s1905_s6] sm:$0x7] }
 0x12a   :  { %v392_v42 = vmax.f32 %v1241_v38, 0.0 }
 0x12b   :  { %v393_v44 = vmax.f32 %v1242_v40, 0.0  ;;  %v725_v40 = vsub.s32 2, %v1753_v27 }
 0x12c   :  { %v394_v45 = vpack.c.bf16 %v392_v42, %v390_v41  ;;  %v718_v41 = vrot.slane %v713_v39, %v1756_v28  ;;  %v722_v42 = vrot.slane %v713_v39, %v1762_v30 }
 0x12d   :  { %v395_v46 = vpack.c.bf16 %v393_v44, %v391_v43 }
 0x12f   :  { %632 = vmatprep.mubr.bf16.mxu1 %v395_v46 }
 0x130   :  { %633 = vmatmul.mubr.bf16.vlgmr.msra.gmra.mrb[0].mxu1 %v394_v45  ;;  %v726_v45 = vrot.slane %v713_v39, %v725_v40 }
 0x131   :  { %987 = vmatpush1.bf16.msra.mxu1 %v1362_v47 }
 0x132   :  { %988 = vmatprep.subr.bf16.mxu1 %v1367_v48 }
 0x135   :  { %989 = vmatpush1.bf16.msra.mxu1 %v1365_v49 }
 0x136   :  { %990 = vmatprep.subr.bf16.mxu1 %v1370_v50 }
 0x139   :  { %991 = vmatpush1.bf16.msra.mxu1 %v1368_v51 }
 0x13a   :  { %992 = vmatprep.subr.bf16.mxu1 %v1373_v52 }
 0x13d   :  { %993 = vmatpush1.bf16.msra.mxu1 %v1371_v53 }
 0x13e   :  { %994 = vmatprep.subr.bf16.mxu1 %v1376_v54 }
 0x141   :  { %995 = vmatpush1.bf16.msra.mxu1 %v1374_v55 }
 0x142   :  { %996 = vmatprep.subr.bf16.mxu1 %v1379_v56 }
 0x145   :  { %997 = vmatpush1.bf16.msra.mxu1 %v1377_v57 }
 0x146   :  { %998 = vmatprep.subr.bf16.mxu1 %v1382_v58 }
 0x149   :  { %999 = vmatpush1.bf16.msra.mxu1 %v1380_v59 }
 0x14a   :  { %1000 = vmatprep.subr.bf16.mxu1 %v1385_v60 }
 0x14d   :  { %1001 = vmatpush1.bf16.msra.mxu1 %v1383_v61 }
 0x14e   :  { %1002 = vmatprep.subr.bf16.mxu1 %v1388_v62 }
 0x151   :  { %1003 = vmatpush1.bf16.msra.mxu1 %v1386_v63 }
 0x152   :  { %1004 = vmatprep.subr.bf16.mxu1 %v1393_v0 }
 0x155   :  { %1005 = vmatpush1.bf16.msra.mxu1 %v1391_v1 }
 0x156   :  { %1006 = vmatprep.subr.bf16.mxu1 %v1398_v2 }
 0x159   :  { %1007 = vmatpush1.bf16.msra.mxu1 %v1396_v3 }
 0x15a   :  { %1008 = vmatprep.subr.bf16.mxu1 %v1403_v4 }
 0x15d   :  { %1009 = vmatpush1.bf16.msra.mxu1 %v1401_v5 }
 0x15e   :  { %1010 = vmatprep.subr.bf16.mxu1 %v1408_v6 }
 0x161   :  { %1011 = vmatpush1.bf16.msra.mxu1 %v1406_v7 }
 0x162   :  { %1012 = vmatprep.subr.bf16.mxu1 %v1413_v8 }
 0x165   :  { %1013 = vmatpush1.bf16.msra.mxu1 %v1411_v9 }
 0x166   :  { %1014 = vmatprep.subr.bf16.mxu1 %v1418_v11 }
 0x169   :  { %1015 = vmatpush1.bf16.msra.mxu1 %v1416_v13 }
 0x16a   :  { %1016 = vmatprep.subr.bf16.mxu1 %v1423_v15 }
 0x16d   :  { %1017 = vmatpush1.bf16.msra.mxu1 %v1421_v17 }
 0x203   :  { %v634_v22 = vpop.f32.mrb[0].mxu1 }
 0x204   :  { %v635_v23 = vadd.f32 %v634_v22, %v433_v20  ;;  %v636_v24 = vpop.f32.mrb[1].mxu1 }
 0x205   :  { %v637_v25 = vadd.f32 %v636_v24, %v437_v21  ;;  %v638_v26 = vpop.f32.mrb[2].mxu1 }
 0x206   :  { %v639_v29 = vadd.f32 %v638_v26, %v433_v20  ;;  %v640_v31 = vpop.f32.mrb[3].mxu1  ;;  %v643_v33 = vmax.f32 %v635_v23, 0.0 }
 0x207   :  { %v641_v32 = vadd.f32 %v640_v31, %v437_v21  ;;  %v644_v35 = vmax.f32 %v637_v25, 0.0 }
 0x208   :  { %v645_v34 = vmax.f32 %v639_v29, 0.0 }
 0x209   :  { %v646_v36 = vmax.f32 %v641_v32, 0.0 }
 0x20a   :  { %v647_v37 = vpack.c.bf16 %v645_v34, %v643_v33 }
 0x20b   :  { %v648_v38 = vpack.c.bf16 %v646_v36, %v644_v35 }
 0x20d   :  { %1018 = vmatprep.mubr.bf16.mxu1 %v648_v38  ;;  %1061 = vmatprep.mubr.bf16.mxu0 %v648_v38 }
 0x20e   :  { %1019 = vmatmul.mubr.bf16.vlgmr.msra.gmra.mrb[4].mxu1 %v647_v37  ;;  %1062 = vmatmul.mubr.bf16.vlgmr.msra.gmra.mrb[4].mxu0 %v647_v37 }
 0x2e1   :  { %v1020_v43 = vpop.f32.mrb[4].mxu1  ;;  %v1233_v44 = vpop.f32.mrb[4].mxu0 }
 0x2e2   :  { %v1021_v46 = vadd.f32 %v1020_v43, %v718_v41  ;;  %v1022_v47 = vpop.f32.mrb[5].mxu1  ;;  %v1234_v48 = vpop.f32.mrb[5].mxu0 }
 0x2e3   :  { %v1023_v49 = vadd.f32 %v1022_v47, %v722_v42  ;;  %v1235_v50 = vadd.f32 %v1234_v48, %v1233_v44  ;;  %v1024_v51 = vpop.f32.mrb[6].mxu1  ;;  %v1236_v52 = vpop.f32.mrb[6].mxu0 }
 0x2e4   :  { %1070 = vst [vmem:[#allocation2] sm:$0xff] %v1021_v46  ;;  %v1025_v53 = vadd.f32 %v1024_v51, %v718_v41  ;;  %v1026_v54 = vpop.f32.mrb[7].mxu1  ;;  %v1237_v55 = vpop.f32.mrb[7].mxu0 }
 0x2e5   :  { %1071 = vst [vmem:[#allocation2 + $0x8] sm:$0xff] %v1023_v49  ;;  %v1064_v27 = vadd.f32 %v1235_v50, %v726_v45  ;;  %v1027_v56 = vadd.f32 %v1026_v54, %v722_v42  ;;  %v1238_v28 = vadd.f32 %v1237_v55, %v1236_v52 }
 0x2e6   :  { %1073 = vst [vmem:[#allocation2 + $0x18] sm:$0xff] %v1025_v53 }
 0x2e7   :  { %1072 = vst.msk [vmem:[#allocation2 + $0x10] sm:$0xff] %vm293_vm1, %v1064_v27  ;;  %1074 = vst [vmem:[#allocation2 + $0x20] sm:$0xff] %v1027_v56  ;;  %v1067_v30 = vadd.f32 %v1238_v28, %v726_v45 }
 0x2e9   :  { %1075 = vst.msk [vmem:[#allocation2 + $0x28] sm:$0xff] %vm293_vm1, %v1067_v30 }
 0x2ea   :  { %1080 = vsyncadd [#allocation3], 384  ;;  %s1451_s6 = smov [#allocation2]  }
 0x2eb   :  { %s1081_s26 = sshll.u32 %s1451_s6, 4  ;;  %s1082_s26 = int_to_ptr.vmem [resolvable:$true] %s1081_s26 }
 0x2ec   :  { %s1426_s27 = scalar_lea.vmem %s1082_s26, 384  ;;  %s1430_s28 = scalar_lea.vmem %s1082_s26, 768 }
 0x2ed   :  { %p1427_p0 = scmp.ne.s32.totalorder %s1082_s26, %s1426_s27  ;;  %p1431_p1 = scmp.lt.s32.totalorder %s1082_s26, %s1082_s26 }
 0x2ee   :  { %p1432_p2 = scmp.lt.s32.totalorder %s1430_s28, %s1426_s27 }
 0x2f0   :  { %p1433_p3 = por %p1432_p2, %p1431_p1 }
 0x2f2   :  { %p1434_p4 = pnand %p1433_p3, %p1427_p0 }
 0x2f4   :  { %1437 = shalt.err (!%p1434_p4)
}
 0x2f5   :  { %s1438_s30 = scalar_lea.hbm %s1906_s7, 384 }
 0x2f6   :  { %p1439_p5 = scmp.ne.s32.totalorder %s1906_s7, %s1438_s30  ;;  %p1442_p6 = scmp.lt.u32.totalorder %s1438_s30, %s1906_s7 }
 0x2f8   :  { %p1444_p7 = pnand %p1442_p6, %p1439_p5 }
 0x2fa   :  { %1447 = shalt.err (!%p1444_p7)
}
 0x2fb   :  { %s1452_s11 = smov 384   ;;  %s1453_s12 = smov 24  }
 0x2fc   :  { %1087 = dma.vmem_to_hbm [thread:$0]  %s1082_s26, 384, %s1906_s7, [#allocation3], %s1452_s11, %s1452_s11, %s1453_s12  }
 0x2fd   :  { %1448 = dma.done.wait [#allocation3], 768  }
 0x2fe   :  { %1449 = vsyncadd [#allocation3], 4294966528 }
 0x2ff   :  { %1091 = vsyncpa [#allocation3], 1 }

</bundles_post_ra>
